<compile_context>
chip_gen: v6e
topology: v6e:2x2x1
jax: 0.10.0
libtpu: 0.0.40
codegen_flags: <defaults>
</compile_context>

<pallas_src>
import functools

import jax
import jax.numpy as jnp
from jax.experimental import pallas as pl
from jax.experimental.pallas import tpu as pltpu

_LANES = 128
_SUBLANES = 8


def _iou_partial_kernel(pred_ref, target_ref, inter_ref, union_ref, *,
                        sub, tile_rows, valid_rows, need_mask, unroll):
    """Accumulate per-(sub,128) intersection and union partial sums."""
    j = pl.program_id(1)  # row-tile index (reduction axis, innermost)

    @pl.when(j == 0)
    def _init():
        inter_ref[...] = jnp.zeros_like(inter_ref)
        union_ref[...] = jnp.zeros_like(union_ref)

    groups = tile_rows // sub          # static
    steps = groups // unroll           # static; unroll divides groups

    def accumulate(masked):
        def load_group(off):
            p = pred_ref[:, pl.ds(off, sub), :].astype(jnp.float32)
            t = target_ref[:, pl.ds(off, sub), :].astype(jnp.float32)
            if masked:
                # Rows past `valid_rows` belong to a partial last block and
                # contain unspecified data; zero them (last tile only).
                row = (j * tile_rows + off
                       + jax.lax.broadcasted_iota(jnp.int32, (1, sub, _LANES), 1))
                keep = row < valid_rows
                p = jnp.where(keep, p, 0.0)
                t = jnp.where(keep, t, 0.0)
            return p, t

        def body(s, carry):
            acc_i, acc_u = carry
            base = s * (sub * unroll)
            for u in range(unroll):                      # static partial unroll
                off = pl.multiple_of(base + u * sub, sub)
                p, t = load_group(off)
                acc_i = acc_i + p * t
                acc_u = acc_u + (p + t)
            return acc_i, acc_u

        acc_i, acc_u = jax.lax.fori_loop(
            0, steps, body, (inter_ref[...], union_ref[...]))
        inter_ref[...] = acc_i
        union_ref[...] = acc_u

    if need_mask:
        last = pl.num_programs(1) - 1

        @pl.when(j != last)
        def _unmasked():
            accumulate(False)

        @pl.when(j == last)
        def _masked():
            accumulate(True)
    else:
        accumulate(False)


def _as_kernel_dtype(x):
    # Keep narrow floating dtypes end-to-end (HBM-bound kernel); cast anything
    # else (bool / int / f64) to f32 for a well-supported VMEM layout.
    if x.dtype in (jnp.float32, jnp.bfloat16, jnp.float16):
        return x
    return x.astype(jnp.float32)


def iou_loss(pred, target, *, tile_rows_max=2048):
    """Pallas implementation of IOU.forward(pred, target) -> scalar."""
    assert pred.shape == target.shape
    n = pred.shape[0]
    d = 1
    for s in pred.shape[1:]:
        d *= int(s)

    pred = _as_kernel_dtype(pred)
    target = _as_kernel_dtype(target)

    # Sublane group size: 8 for f32, 16 for bf16/f16 (packed min tile).
    sub = max(_SUBLANES,
              32 // jnp.dtype(pred.dtype).itemsize,
              32 // jnp.dtype(target.dtype).itemsize)

    # Lane padding only when C*H*W is not a multiple of 128 (rare), or when the
    # sample is smaller than one sublane group (tiny).  Zero padding is
    # sum-safe for both intersection and union.
    d_pad = max(pl.cdiv(d, _LANES) * _LANES, sub * _LANES)
    pred2 = pred.reshape(n, d)
    target2 = target.reshape(n, d)
    if d_pad != d:
        # TODO(synk): could avoid this full-copy pad with an element-index mask
        # in-kernel; only hit when C*H*W % 128 != 0.
        pad = ((0, 0), (0, d_pad - d))
        pred2 = jnp.pad(pred2, pad)
        target2 = jnp.pad(target2, pad)
    r = d_pad // _LANES

    pred3 = pred2.reshape(n, r, _LANES)
    target3 = target2.reshape(n, r, _LANES)

    # Row tiling: tile_rows is a multiple of `sub`; a ragged tail (r not a
    # multiple of tile_rows) is handled by masking the last tile in-kernel.
    tr_max = max(sub, (tile_rows_max // sub) * sub)
    tile_rows = min(tr_max, (r // sub) * sub)
    num_row_tiles = pl.cdiv(r, tile_rows)
    need_mask = (r % tile_rows) != 0

    # Batch-axis blocking: when R is small, process several samples per grid
    # step so each DMA moves ~tr_max rows (amortizes grid-step overhead).
    bn = min(n, max(1, tr_max // tile_rows))
    while n % bn != 0:
        bn -= 1

    groups = tile_rows // sub
    unroll = 1
    for u in (8, 4, 2):
        if groups % u == 0 and u * bn <= 8:   # bound live vregs per unrolled chunk
            unroll = u
            break

    # TODO(synk): v7x-only dual-TensorCore split of the row axis for N == 1 is
    # not implemented; on v5e/v6e it would be pure overhead.

    kernel = functools.partial(
        _iou_partial_kernel, sub=sub, tile_rows=tile_rows, valid_rows=r,
        need_mask=need_mask, unroll=unroll)

    acc_shape = jax.ShapeDtypeStruct((n, sub, _LANES), jnp.float32)
    in_spec = pl.BlockSpec((bn, tile_rows, _LANES), lambda i, j: (i, j, 0))
    acc_spec = pl.BlockSpec((bn, sub, _LANES), lambda i, j: (i, 0, 0))

    inter, union = pl.pallas_call(
        kernel,
        out_shape=(acc_shape, acc_shape),
        grid_spec=pltpu.PrefetchScalarGridSpec(
            num_scalar_prefetch=0,
            grid=(n // bn, num_row_tiles),
            in_specs=[in_spec, in_spec],
            out_specs=[acc_spec, acc_spec],
        ),
        compiler_params=pltpu.CompilerParams(
            dimension_semantics=("parallel", "arbitrary"),
            vmem_limit_bytes=32 * 1024 * 1024,
        ),
    )(pred3, target3)

    # Tiny cross-lane reductions + IoU arithmetic on (N,)-sized data in XLA.
    inter_s = jnp.sum(inter, axis=(1, 2))
    union_s = jnp.sum(union, axis=(1, 2))
    iou = inter_s / (union_s - inter_s)
    return jnp.sum(1.0 - iou) / jnp.float32(n)


def _iou_ref(pred, target):
    b = pred.shape[0]
    p = pred.reshape(b, -1).astype(jnp.float32)
    t = target.reshape(b, -1).astype(jnp.float32)
    iand = jnp.sum(t * p, axis=1)
    ior = jnp.sum(t, axis=1) + jnp.sum(p, axis=1) - iand
    return jnp.sum(1.0 - iand / ior) / b


if __name__ == "__main__":
    key = jax.random.PRNGKey(0)
    k1, k2 = jax.random.split(key)

    # Small shapes consistent with a segmentation head: (N, C, H, W)
    pred = jax.nn.sigmoid(jax.random.normal(k1, (2, 4, 16, 16), jnp.float32))
    target = (jax.random.uniform(k2, (2, 4, 16, 16)) > 0.5).astype(jnp.float32)

    loss = iou_loss(pred, target)
    jax.block_until_ready(loss)

    ref = _iou_ref(pred, target)
    assert jnp.allclose(loss, ref, rtol=1e-5, atol=1e-5), (loss, ref)

    print("KERNEL_OK")
</pallas_src>

<mosaic_0001>
module attributes {stable_mosaic.version = 11 : i64} {
  func.func @_iou_partial_kernel(%arg0: i32, %arg1: i32, %arg2: memref<2x8x128xf32, #tpu.memory_space<vmem>>, %arg3: memref<2x8x128xf32, #tpu.memory_space<vmem>>, %arg4: memref<2x8x128xf32, #tpu.memory_space<vmem>>, %arg5: memref<2x8x128xf32, #tpu.memory_space<vmem>>) attributes {dimension_semantics = [#tpu.dimension_semantics<parallel>, #tpu.dimension_semantics<arbitrary>], iteration_bounds = array<i64: 1, 1>, scalar_prefetch = 0 : i64, scratch_operands = 0 : i64, tpu.core_type = #tpu.core_type<tc>, window_params = [{transform_indices = @transform_0, window_bounds = array<i64: 2, 8, 128>}, {transform_indices = @transform_1, window_bounds = array<i64: 2, 8, 128>}, {transform_indices = @transform_2, window_bounds = array<i64: 2, 8, 128>}, {transform_indices = @transform_3, window_bounds = array<i64: 2, 8, 128>}]} {
    %c0_i32 = arith.constant 0 : i32
    %0 = arith.cmpi eq, %arg1, %c0_i32 : i32
    %1 = arith.extui %0 : i1 to i32
    %c0_i32_0 = arith.constant 0 : i32
    %2 = arith.cmpi ne, %1, %c0_i32_0 : i32
    scf.if %2 {
      %cst = arith.constant 0.000000e+00 : f32
      %18 = vector.broadcast %cst : f32 to vector<2x8x128xf32>
      %c0_18 = arith.constant 0 : index
      %c0_19 = arith.constant 0 : index
      %c0_20 = arith.constant 0 : index
      %19 = vector.load %arg4[%c0_18, %c0_19, %c0_20] : memref<2x8x128xf32, #tpu.memory_space<vmem>>, vector<2x8x128xf32>
      tpu.vector_store %arg4[%c0_18, %c0_19, %c0_20], %18 {strides = array<i32>} : memref<2x8x128xf32, #tpu.memory_space<vmem>>, vector<2x8x128xf32>,
      %cst_21 = arith.constant 0.000000e+00 : f32
      %20 = vector.broadcast %cst_21 : f32 to vector<2x8x128xf32>
      %c0_22 = arith.constant 0 : index
      %c0_23 = arith.constant 0 : index
      %c0_24 = arith.constant 0 : index
      %21 = vector.load %arg5[%c0_22, %c0_23, %c0_24] : memref<2x8x128xf32, #tpu.memory_space<vmem>>, vector<2x8x128xf32>
      tpu.vector_store %arg5[%c0_22, %c0_23, %c0_24], %20 {strides = array<i32>} : memref<2x8x128xf32, #tpu.memory_space<vmem>>, vector<2x8x128xf32>,
    } else {
    }
    %c0 = arith.constant 0 : index
    %c0_1 = arith.constant 0 : index
    %c0_2 = arith.constant 0 : index
    %3 = vector.load %arg4[%c0, %c0_1, %c0_2] : memref<2x8x128xf32, #tpu.memory_space<vmem>>, vector<2x8x128xf32>
    %c0_3 = arith.constant 0 : index
    %c0_4 = arith.constant 0 : index
    %c0_5 = arith.constant 0 : index
    %4 = vector.load %arg5[%c0_3, %c0_4, %c0_5] : memref<2x8x128xf32, #tpu.memory_space<vmem>>, vector<2x8x128xf32>
    %c0_i32_6 = arith.constant 0 : i32
    %c8_i32 = arith.constant 8 : i32
    %5 = arith.muli %c0_i32_6, %c8_i32 : i32
    %c0_i32_7 = arith.constant 0 : i32
    %6 = arith.addi %5, %c0_i32_7 : i32
    %7 = tpu.assume_multiple %6, 8 : i32
    %c0_8 = arith.constant 0 : index
    %8 = arith.index_cast %7 : i32 to index
    %c0_9 = arith.constant 0 : index
    %9 = vector.load %arg2[%c0_8, %8, %c0_9] : memref<2x8x128xf32, #tpu.memory_space<vmem>>, vector<2x8x128xf32>
    %c0_10 = arith.constant 0 : index
    %10 = arith.index_cast %7 : i32 to index
    %c0_11 = arith.constant 0 : index
    %11 = vector.load %arg3[%c0_10, %10, %c0_11] : memref<2x8x128xf32, #tpu.memory_space<vmem>>, vector<2x8x128xf32>
    %12 = arith.mulf %9, %11 : vector<2x8x128xf32>
    %13 = arith.addf %3, %12 : vector<2x8x128xf32>
    %14 = arith.addf %9, %11 : vector<2x8x128xf32>
    %15 = arith.addf %4, %14 : vector<2x8x128xf32>
    %c1_i32 = arith.constant 1 : i32
    %c0_12 = arith.constant 0 : index
    %c0_13 = arith.constant 0 : index
    %c0_14 = arith.constant 0 : index
    %16 = vector.load %arg4[%c0_12, %c0_13, %c0_14] : memref<2x8x128xf32, #tpu.memory_space<vmem>>, vector<2x8x128xf32>
    tpu.vector_store %arg4[%c0_12, %c0_13, %c0_14], %13 {strides = array<i32>} : memref<2x8x128xf32, #tpu.memory_space<vmem>>, vector<2x8x128xf32>,
    %c0_15 = arith.constant 0 : index
    %c0_16 = arith.constant 0 : index
    %c0_17 = arith.constant 0 : index
    %17 = vector.load %arg5[%c0_15, %c0_16, %c0_17] : memref<2x8x128xf32, #tpu.memory_space<vmem>>, vector<2x8x128xf32>
    tpu.vector_store %arg5[%c0_15, %c0_16, %c0_17], %15 {strides = array<i32>} : memref<2x8x128xf32, #tpu.memory_space<vmem>>, vector<2x8x128xf32>,
    return
  }
  func.func @transform_0(%arg0: i32, %arg1: i32) -> (i32, i32, i32) {
    %c0_i32 = arith.constant 0 : i32
    %c0_i32_0 = arith.constant 0 : i32
    return %arg0, %arg1, %c0_i32 : i32, i32, i32
  }
  func.func @transform_1(%arg0: i32, %arg1: i32) -> (i32, i32, i32) {
    %c0_i32 = arith.constant 0 : i32
    %c0_i32_0 = arith.constant 0 : i32
    return %arg0, %arg1, %c0_i32 : i32, i32, i32
  }
  func.func @transform_2(%arg0: i32, %arg1: i32) -> (i32, i32, i32) {
    %c0_i32 = arith.constant 0 : i32
    %c0_i32_0 = arith.constant 0 : i32
    %c0_i32_1 = arith.constant 0 : i32
    return %arg0, %c0_i32, %c0_i32_0 : i32, i32, i32
  }
  func.func @transform_3(%arg0: i32, %arg1: i32) -> (i32, i32, i32) {
    %c0_i32 = arith.constant 0 : i32
    %c0_i32_0 = arith.constant 0 : i32
    %c0_i32_1 = arith.constant 0 : i32
    return %arg0, %c0_i32, %c0_i32_0 : i32, i32, i32
  }
}

</mosaic_0001>

<bundles_post_ra>
// kernel: tpu_custom_call.1
= control target key start
LH: loop header
LB: loop body
LE: loop exit
PB: predicated region body
PF: predicated region fallthrough
CT: control target
= control target key end

     0   :  { %9 = vsyncpa [#allocation3], 0  ;;  %s250_s0 = inlined_call_operand.hbm [shape: f32[2,8,128], index: 0, kind: input, shape index: {}]   ;;  %s251_s1 = inlined_call_operand.hbm [shape: f32[2,8,128], index: 1, kind: input, shape index: {}]   ;;  %s252_s2 = inlined_call_operand.hbm [shape: f32[2,8,128], index: 2, kind: output, shape index: {0}]   ;;  %s253_s3 = inlined_call_operand.hbm [shape: f32[2,8,128], index: 3, kind: output, shape index: {1}]  }
   0x1   :  { %10 = vsyncpa [#allocation6], 0 }
   0x2   :  { %11 = vsyncpa [#allocation4], 0 }
   0x3   :  { %12 = vsyncpa [#allocation9], 0  ;;  %s200_s12 = smov [#allocation2]  }
   0x4   :  { %s18_s13 = sshll.u32 %s200_s12, 4  ;;  %s19_s13 = int_to_ptr.vmem [resolvable:$true] %s18_s13 }
   0x5   :  { %s120_s14 = scalar_lea.vmem %s19_s13, 256  ;;  %p125_p1 = scmp.lt.s32.totalorder %s19_s13, %s19_s13 }
   0x6   :  { %p121_p0 = scmp.ne.s32.totalorder %s19_s13, %s120_s14  ;;  %p126_p2 = scmp.lt.s32.totalorder %s120_s14, %s120_s14 }
   0x8   :  { %p127_p3 = por %p126_p2, %p125_p1 }
   0xa   :  { %p128_p4 = pnand %p127_p3, %p121_p0 }
   0xc   :  { %131 = shalt.err (!%p128_p4)
}
   0xd   :  { %s201_s15 = smov 128   ;;  %s202_s16 = smov 8  }
   0xe   :  { %24 = dma.hbm_to_vmem [thread:$0]  %s250_s0, 256, %s19_s13, [#allocation3], %s201_s15, %s201_s15, %s202_s16  }
   0xf   :  { %s203_s19 = smov [#allocation5]  }
  0x10   :  { %s30_s20 = sshll.u32 %s203_s19, 4  ;;  %s31_s20 = int_to_ptr.vmem [resolvable:$true] %s30_s20 }
  0x11   :  { %s140_s21 = scalar_lea.vmem %s31_s20, 256  ;;  %p145_p6 = scmp.lt.s32.totalorder %s31_s20, %s31_s20 }
  0x12   :  { %p141_p5 = scmp.ne.s32.totalorder %s31_s20, %s140_s21  ;;  %p146_p7 = scmp.lt.s32.totalorder %s140_s21, %s140_s21 }
  0x14   :  { %p147_p8 = por %p146_p7, %p145_p6 }
  0x16   :  { %p148_p9 = pnand %p147_p8, %p141_p5 }
  0x18   :  { %151 = shalt.err (!%p148_p9)
}
  0x19   :  { %36 = dma.hbm_to_vmem [thread:$0]  %s251_s1, 256, %s31_s20, [#allocation6], %s201_s15, %s201_s15, %s202_s16  }
  0x1a   :  { %192 = dma.done.wait [#allocation3], 256  }
  0x1b   :  { %193 = vsyncadd [#allocation3], 4294967040 }
  0x1c   :  { %194 = dma.done.wait [#allocation6], 256  }
  0x1d   :  { %195 = vsyncadd [#allocation6], 4294967040  ;;  %v55_v0 = vld [vmem:[#allocation2] sm:$0xff]  ;;  %v57_v1 = vld [vmem:[#allocation5] sm:$0xff]  ;;  %s204_s0 = smov [#allocation7]   ;;  %s205_s25 = smov [#allocation8]  }
  0x1e   :  { %v56_v2 = vld [vmem:[#allocation2 + $0x8] sm:$0xff]  ;;  %v59_v3 = vmul.f32 %v57_v1, %v55_v0  ;;  %v58_v4 = vld [vmem:[#allocation5 + $0x8] sm:$0xff]  ;;  %v63_v5 = vadd.f32 %v57_v1, %v55_v0  ;;  %s76_s24 = sshll.u32 %s204_s0, 4  ;;  %s88_s26 = sshll.u32 %s205_s25, 4  ;;  %s77_s24 = int_to_ptr.vmem [resolvable:$true] %s76_s24  ;;  %s89_s26 = int_to_ptr.vmem [resolvable:$true] %s88_s26 }
  0x1f   :  { %v60_v6 = vmul.f32 %v58_v4, %v56_v2  ;;  %v64_v7 = vadd.f32 %v58_v4, %v56_v2  ;;  %s152_s1 = scalar_lea.vmem %s77_s24, 256  ;;  %p157_p11 = scmp.lt.s32.totalorder %s77_s24, %s77_s24 }
  0x20   :  { %67 = vst [vmem:[#allocation7] sm:$0xff] %v59_v3  ;;  %69 = vst [vmem:[#allocation8] sm:$0xff] %v63_v5  ;;  %p153_p10 = scmp.ne.s32.totalorder %s77_s24, %s152_s1  ;;  %p158_p12 = scmp.lt.s32.totalorder %s152_s1, %s152_s1 }
  0x21   :  { %68 = vst [vmem:[#allocation7 + $0x8] sm:$0xff] %v60_v6  ;;  %70 = vst [vmem:[#allocation8 + $0x8] sm:$0xff] %v64_v7 }
  0x22   :  { %p159_p13 = por %p158_p12, %p157_p11 }
  0x24   :  { %p160_p0 = pnand %p159_p13, %p153_p10 }
  0x26   :  { %163 = shalt.err (!%p160_p0)
}
  0x27   :  { %82 = dma.vmem_to_hbm [thread:$0]  %s77_s24, 256, %s252_s2, [#allocation4], %s201_s15, %s201_s15, %s202_s16  }
  0x28   :  { %s172_s29 = scalar_lea.vmem %s89_s26, 256  ;;  %p177_p2 = scmp.lt.s32.totalorder %s89_s26, %s89_s26 }
  0x29   :  { %p173_p1 = scmp.ne.s32.totalorder %s89_s26, %s172_s29  ;;  %p178_p3 = scmp.lt.s32.totalorder %s172_s29, %s172_s29 }
  0x2b   :  { %p179_p4 = por %p178_p3, %p177_p2 }
  0x2d   :  { %p180_p5 = pnand %p179_p4, %p173_p1 }
  0x2f   :  { %183 = shalt.err (!%p180_p5)
}
  0x30   :  { %94 = dma.vmem_to_hbm [thread:$0]  %s89_s26, 256, %s253_s3, [#allocation9], %s201_s15, %s201_s15, %s202_s16  }
  0x31   :  { %196 = dma.done.wait [#allocation4], 256  }
  0x32   :  { %197 = vsyncadd [#allocation4], 4294967040 }
  0x33   :  { %198 = dma.done.wait [#allocation9], 256  }
  0x34   :  { %199 = vsyncadd [#allocation9], 4294967040 }
  0x35   :  { %101 = vsyncpa [#allocation3], 1 }
  0x36   :  { %102 = vsyncpa [#allocation6], 1 }
  0x37   :  { %103 = vsyncpa [#allocation4], 1 }
  0x38   :  { %104 = vsyncpa [#allocation9], 1 }

</bundles_post_ra>
